<compile_context>
chip_gen: v7x
topology: tpu7x:2x2x1
jax: 0.10.0
libtpu: 0.0.40
codegen_flags: <defaults>
</compile_context>

<pallas_src>
import functools

import jax
import jax.numpy as jnp
from jax import lax
from jax.experimental import pallas as pl
from jax.experimental.pallas import tpu as pltpu

_LANE = 128
_SUB = 8
_ALIGN = _SUB * _LANE  # 1024


def _num_tensorcores():
    """2 on multi-TensorCore-per-device chips (v4/v5p megacore, v7x), else 1."""
    try:
        kind = jax.devices()[0].device_kind.lower()
    except Exception:  # pragma: no cover - defensive
        return 1
    if "lite" in kind or "v5e" in kind or "v6e" in kind:
        return 1
    for tag in ("v4", "v5p", "v7"):
        if tag in kind:
            return 2
    return 1


def _pick_chunk_rows(tm):
    """Largest chunk size (<=256 rows, multiple of 8) dividing tm."""
    for c in (256, 128, 64, 32, 16, 8):
        if tm % c == 0:
            return c
    return 8  # unreachable: tm is always a multiple of 8


def _bce_dice_kernel(p_ref, t_ref, out_ref, *, tm, chunk_rows, blocks_per_core,
                     num_blocks, rows, need_row_mask, has_redundant):
    c = pl.program_id(0)   # core-split axis ("parallel")
    i = pl.program_id(1)   # streaming / reduction axis ("arbitrary")
    logical_block = c * blocks_per_core + i

    @pl.when(i == 0)
    def _init():
        out_ref[...] = jnp.zeros_like(out_ref)

    n_chunks = tm // chunk_rows

    def accumulate(masked):
        def body(j, carry):
            acc_s, acc_pt, acc_p, acc_t = carry
            off = pl.multiple_of(j * chunk_rows, chunk_rows)
            p = p_ref[pl.ds(off, chunk_rows), :].astype(jnp.float32)
            t = t_ref[pl.ds(off, chunk_rows), :].astype(jnp.float32)
            if masked:
                # Only the last real block has out-of-range rows (Pallas pads
                # the non-dividing edge block with unspecified data).
                valid_rows = rows - logical_block * tm
                ridx = lax.broadcasted_iota(jnp.int32, (chunk_rows, _LANE), 0) + off
                ok = ridx < valid_rows
                p = jnp.where(ok, p, 0.0)
                t = jnp.where(ok, t, 0.0)
            # torch.nn.BCELoss clamps log terms at -100; this also makes masked
            # (p=0, t=0) rows contribute exactly 0 to the BCE sum.
            log_p = jnp.maximum(jnp.log(p), -100.0)
            log_1mp = jnp.maximum(jnp.log(1.0 - p), -100.0)
            # s == -(elementwise BCE); the single negation happens in the wrapper.
            s = t * (log_p - log_1mp) + log_1mp

            def fold(x):  # (chunk_rows, 128) -> (8, 128): pure VPU vreg adds
                return jnp.sum(x.reshape(chunk_rows // _SUB, _SUB, _LANE), axis=0)

            return (acc_s + fold(s), acc_pt + fold(p * t),
                    acc_p + fold(p), acc_t + fold(t))

        zero = jnp.zeros((_SUB, _LANE), jnp.float32)
        unroll = True if n_chunks <= 8 else 4
        acc_s, acc_pt, acc_p, acc_t = lax.fori_loop(
            0, n_chunks, body, (zero, zero, zero, zero), unroll=unroll)
        out_ref[0, 0, :, :] += acc_s
        out_ref[0, 1, :, :] += acc_pt
        out_ref[0, 2, :, :] += acc_p
        out_ref[0, 3, :, :] += acc_t

    if need_row_mask:
        last = num_blocks - 1

        @pl.when(logical_block < last)       # full interior blocks: no mask cost
        def _full():
            accumulate(False)

        @pl.when(logical_block == last)      # single edge block: masked
        def _edge():
            accumulate(True)
    elif has_redundant:
        @pl.when(logical_block < num_blocks)  # skip clamped redundant blocks
        def _real():
            accumulate(False)
    else:
        accumulate(False)


def _partial_sums_plain(p, t):
    """(sum of -(BCE elem), sum(p*t), sum(p), sum(t)) in plain JAX (tiny tails)."""
    p = p.astype(jnp.float32)
    t = t.astype(jnp.float32)
    log_p = jnp.maximum(jnp.log(p), -100.0)
    log_1mp = jnp.maximum(jnp.log(1.0 - p), -100.0)
    s = jnp.sum(t * (log_p - log_1mp) + log_1mp)
    return s, jnp.sum(p * t), jnp.sum(p), jnp.sum(t)


def bce_dice_loss(pred, target, *, smooth=1e-5, bce_weight=0.5, tm_max=4096):
    """JAX/Pallas equivalent of BCEDiceLoss.forward(pred, target)."""
    assert pred.shape == target.shape
    n = pred.size
    p_flat = pred.reshape(-1)   # row-major flatten == torch .view(-1)
    t_flat = target.reshape(-1)

    n_main = (n // _ALIGN) * _ALIGN     # 1024-aligned prefix -> (rows, 128) view
    rows = n_main // _LANE              # multiple of 8

    if rows == 0:
        # Fewer than 1024 elements: not worth a kernel launch.
        s, inter, p_sum, t_sum = _partial_sums_plain(p_flat, t_flat)
    else:
        p_main = p_flat if n_main == n else p_flat[:n_main]
        t_main = t_flat if n_main == n else t_flat[:n_main]
        p2 = p_main.reshape(rows, _LANE)
        t2 = t_main.reshape(rows, _LANE)

        tm_max = max(_SUB, (int(tm_max) // _SUB) * _SUB)
        tm = min(tm_max, rows)                      # multiple of 8
        chunk_rows = _pick_chunk_rows(tm)
        num_blocks = pl.cdiv(rows, tm)
        need_row_mask = (rows % tm) != 0
        num_cores = min(_num_tensorcores(), num_blocks)
        bpc = pl.cdiv(num_blocks, num_cores)
        has_redundant = (num_cores * bpc) != num_blocks

        def in_map(c, i):
            # Clamp so redundant blocks never address a window fully outside
            # the array; their compute is skipped by the pl.when gates.
            return (jnp.minimum(c * bpc + i, num_blocks - 1), 0)

        kernel = functools.partial(
            _bce_dice_kernel, tm=tm, chunk_rows=chunk_rows,
            blocks_per_core=bpc, num_blocks=num_blocks, rows=rows,
            need_row_mask=need_row_mask, has_redundant=has_redundant)

        partials = pl.pallas_call(
            kernel,
            out_shape=jax.ShapeDtypeStruct((num_cores, 4, _SUB, _LANE),
                                           jnp.float32),
            grid_spec=pltpu.PrefetchScalarGridSpec(
                num_scalar_prefetch=0,
                grid=(num_cores, bpc),
                in_specs=[pl.BlockSpec((tm, _LANE), in_map),
                          pl.BlockSpec((tm, _LANE), in_map)],
                out_specs=pl.BlockSpec((1, 4, _SUB, _LANE),
                                       lambda c, i: (c, 0, 0, 0)),
            ),
            compiler_params=pltpu.CompilerParams(
                dimension_semantics=("parallel", "arbitrary"),
                vmem_limit_bytes=32 * 1024 * 1024),
        )(p2, t2)

        # Single cross-lane reduction + scalar assembly (tiny) in plain JAX.
        sums = jnp.sum(partials, axis=(0, 2, 3))    # (4,)
        s, inter, p_sum, t_sum = sums[0], sums[1], sums[2], sums[3]

        if n_main != n:  # <1024-element tail
            s_t, i_t, p_t, t_t = _partial_sums_plain(p_flat[n_main:],
                                                     t_flat[n_main:])
            s, inter, p_sum, t_sum = s + s_t, inter + i_t, p_sum + p_t, t_sum + t_t

    bce = -s / jnp.float32(n)
    dice = (2.0 * inter + jnp.float32(smooth)) / (
        p_sum + t_sum + jnp.float32(smooth))
    dice_loss = 1.0 - dice
    return bce * jnp.float32(bce_weight) + dice_loss * jnp.float32(1.0 - bce_weight)


def _reference(pred, target, smooth=1e-5, bce_weight=0.5):
    p = pred.reshape(-1).astype(jnp.float32)
    t = target.reshape(-1).astype(jnp.float32)
    log_p = jnp.maximum(jnp.log(p), -100.0)
    log_1mp = jnp.maximum(jnp.log(1.0 - p), -100.0)
    bce = jnp.mean(-(t * log_p + (1.0 - t) * log_1mp))
    inter = jnp.sum(p * t)
    dice = (2.0 * inter + smooth) / (jnp.sum(p) + jnp.sum(t) + smooth)
    return bce * bce_weight + (1.0 - dice) * (1.0 - bce_weight)


if __name__ == "__main__":
    key = jax.random.PRNGKey(0)
    k1, k2, k3, k4 = jax.random.split(key, 4)

    # NCHW as the PyTorch module would receive: (batch=2, ch=4, 16, 16).
    pred = jax.nn.sigmoid(jax.random.normal(k1, (2, 4, 16, 16), jnp.float32))
    target = (jax.random.uniform(k2, (2, 4, 16, 16)) > 0.5).astype(jnp.float32)

    loss = jax.block_until_ready(bce_dice_loss(pred, target))
    ref = _reference(pred, target)
    assert jnp.isfinite(loss), "non-finite loss"
    assert abs(float(loss) - float(ref)) < 1e-4, (float(loss), float(ref))

    # Non-1024-aligned element count exercises the wrapper tail path.
    pred2 = jax.nn.sigmoid(jax.random.normal(k3, (2, 3, 17, 19), jnp.float32))
    target2 = (jax.random.uniform(k4, (2, 3, 17, 19)) > 0.5).astype(jnp.float32)
    loss2 = jax.block_until_ready(bce_dice_loss(pred2, target2))
    ref2 = _reference(pred2, target2)
    assert abs(float(loss2) - float(ref2)) < 1e-4, (float(loss2), float(ref2))

    # Small tm_max forces multi-block streaming + masked last-block path.
    pred3 = jax.nn.sigmoid(jax.random.normal(k3, (2, 4, 16, 24), jnp.float32))
    target3 = (jax.random.uniform(k4, (2, 4, 16, 24)) > 0.5).astype(jnp.float32)
    loss3 = jax.block_until_ready(bce_dice_loss(pred3, target3, tm_max=16))
    ref3 = _reference(pred3, target3)
    assert abs(float(loss3) - float(ref3)) < 1e-4, (float(loss3), float(ref3))

    print("KERNEL_OK")
</pallas_src>

<mosaic_0001>
module attributes {stable_mosaic.version = 11 : i64} {
  func.func @_bce_dice_kernel(%arg0: i32, %arg1: i32, %arg2: memref<16x128xf32, #tpu.memory_space<vmem>>, %arg3: memref<16x128xf32, #tpu.memory_space<vmem>>, %arg4: memref<1x4x8x128xf32, #tpu.memory_space<vmem>>) attributes {dimension_semantics = [#tpu.dimension_semantics<parallel>, #tpu.dimension_semantics<arbitrary>], iteration_bounds = array<i64: 1, 1>, scalar_prefetch = 0 : i64, scratch_operands = 0 : i64, tpu.core_type = #tpu.core_type<tc>, window_params = [{transform_indices = @transform_0, window_bounds = array<i64: 16, 128>}, {transform_indices = @transform_1, window_bounds = array<i64: 16, 128>}, {transform_indices = @transform_2, window_bounds = array<i64: 1, 4, 8, 128>}]} {
    %c0_i32 = arith.constant 0 : i32
    %0 = arith.cmpi eq, %arg1, %c0_i32 : i32
    %1 = arith.extui %0 : i1 to i32
    %c0_i32_0 = arith.constant 0 : i32
    %2 = arith.cmpi ne, %1, %c0_i32_0 : i32
    scf.if %2 {
      %cst_39 = arith.constant 0.000000e+00 : f32
      %58 = vector.broadcast %cst_39 : f32 to vector<1x4x8x128xf32>
      %c0_40 = arith.constant 0 : index
      %c0_41 = arith.constant 0 : index
      %c0_42 = arith.constant 0 : index
      %c0_43 = arith.constant 0 : index
      %59 = vector.load %arg4[%c0_40, %c0_41, %c0_42, %c0_43] : memref<1x4x8x128xf32, #tpu.memory_space<vmem>>, vector<1x4x8x128xf32>
      tpu.vector_store %arg4[%c0_40, %c0_41, %c0_42, %c0_43], %58 {strides = array<i32>} : memref<1x4x8x128xf32, #tpu.memory_space<vmem>>, vector<1x4x8x128xf32>,
    } else {
    }
    %cst = arith.constant 0.000000e+00 : f32
    %3 = vector.broadcast %cst : f32 to vector<8x128xf32>
    %c0_i32_1 = arith.constant 0 : i32
    %c16_i32 = arith.constant 16 : i32
    %4 = arith.muli %c0_i32_1, %c16_i32 : i32
    %5 = tpu.assume_multiple %4, 16 : i32
    %6 = arith.index_cast %5 : i32 to index
    %c0 = arith.constant 0 : index
    %7 = vector.load %arg2[%6, %c0] : memref<16x128xf32, #tpu.memory_space<vmem>>, vector<16x128xf32>
    %8 = arith.index_cast %5 : i32 to index
    %c0_2 = arith.constant 0 : index
    %9 = vector.load %arg3[%8, %c0_2] : memref<16x128xf32, #tpu.memory_space<vmem>>, vector<16x128xf32>
    %10 = math.log %7 : vector<16x128xf32>
    %cst_3 = arith.constant -1.000000e+02 : f32
    %11 = vector.broadcast %cst_3 : f32 to vector<16x128xf32>
    %12 = arith.maximumf %10, %11 : vector<16x128xf32>
    %cst_4 = arith.constant 1.000000e+00 : f32
    %13 = vector.broadcast %cst_4 : f32 to vector<16x128xf32>
    %14 = arith.subf %13, %7 : vector<16x128xf32>
    %15 = math.log %14 : vector<16x128xf32>
    %cst_5 = arith.constant -1.000000e+02 : f32
    %16 = vector.broadcast %cst_5 : f32 to vector<16x128xf32>
    %17 = arith.maximumf %15, %16 : vector<16x128xf32>
    %18 = arith.subf %12, %17 : vector<16x128xf32>
    %19 = arith.mulf %9, %18 : vector<16x128xf32>
    %20 = arith.addf %19, %17 : vector<16x128xf32>
    %21 = vector.shape_cast %20 : vector<16x128xf32> to vector<2x8x128xf32>
    %cst_6 = arith.constant dense<0.000000e+00> : vector<8x128xf32>
    %22 = vector.multi_reduction <add>, %21, %cst_6 [0] : vector<2x8x128xf32> to vector<8x128xf32>
    %23 = arith.addf %3, %22 : vector<8x128xf32>
    %24 = arith.mulf %7, %9 : vector<16x128xf32>
    %25 = vector.shape_cast %24 : vector<16x128xf32> to vector<2x8x128xf32>
    %cst_7 = arith.constant dense<0.000000e+00> : vector<8x128xf32>
    %26 = vector.multi_reduction <add>, %25, %cst_7 [0] : vector<2x8x128xf32> to vector<8x128xf32>
    %27 = arith.addf %3, %26 : vector<8x128xf32>
    %28 = vector.shape_cast %7 : vector<16x128xf32> to vector<2x8x128xf32>
    %cst_8 = arith.constant dense<0.000000e+00> : vector<8x128xf32>
    %29 = vector.multi_reduction <add>, %28, %cst_8 [0] : vector<2x8x128xf32> to vector<8x128xf32>
    %30 = arith.addf %3, %29 : vector<8x128xf32>
    %31 = vector.shape_cast %9 : vector<16x128xf32> to vector<2x8x128xf32>
    %cst_9 = arith.constant dense<0.000000e+00> : vector<8x128xf32>
    %32 = vector.multi_reduction <add>, %31, %cst_9 [0] : vector<2x8x128xf32> to vector<8x128xf32>
    %33 = arith.addf %3, %32 : vector<8x128xf32>
    %c1_i32 = arith.constant 1 : i32
    %c0_10 = arith.constant 0 : index
    %c0_11 = arith.constant 0 : index
    %c0_12 = arith.constant 0 : index
    %c0_13 = arith.constant 0 : index
    %34 = vector.load %arg4[%c0_10, %c0_11, %c0_12, %c0_13] : memref<1x4x8x128xf32, #tpu.memory_space<vmem>>, vector<1x1x8x128xf32>
    %35 = vector.shape_cast %34 : vector<1x1x8x128xf32> to vector<8x128xf32>
    %36 = arith.addf %35, %23 : vector<8x128xf32>
    %c0_14 = arith.constant 0 : index
    %c0_15 = arith.constant 0 : index
    %c0_16 = arith.constant 0 : index
    %c0_17 = arith.constant 0 : index
    %37 = vector.load %arg4[%c0_14, %c0_15, %c0_16, %c0_17] : memref<1x4x8x128xf32, #tpu.memory_space<vmem>>, vector<1x1x8x128xf32>
    %38 = vector.shape_cast %37 : vector<1x1x8x128xf32> to vector<8x128xf32>
    %39 = vector.shape_cast %36 : vector<8x128xf32> to vector<1x1x8x128xf32>
    tpu.vector_store %arg4[%c0_14, %c0_15, %c0_16, %c0_17], %39 {strides = array<i32>} : memref<1x4x8x128xf32, #tpu.memory_space<vmem>>, vector<1x1x8x128xf32>,
    %c0_18 = arith.constant 0 : index
    %c1 = arith.constant 1 : index
    %c0_19 = arith.constant 0 : index
    %c0_20 = arith.constant 0 : index
    %40 = vector.load %arg4[%c0_18, %c1, %c0_19, %c0_20] : memref<1x4x8x128xf32, #tpu.memory_space<vmem>>, vector<1x1x8x128xf32>
    %41 = vector.shape_cast %40 : vector<1x1x8x128xf32> to vector<8x128xf32>
    %42 = arith.addf %41, %27 : vector<8x128xf32>
    %c0_21 = arith.constant 0 : index
    %c1_22 = arith.constant 1 : index
    %c0_23 = arith.constant 0 : index
    %c0_24 = arith.constant 0 : index
    %43 = vector.load %arg4[%c0_21, %c1_22, %c0_23, %c0_24] : memref<1x4x8x128xf32, #tpu.memory_space<vmem>>, vector<1x1x8x128xf32>
    %44 = vector.shape_cast %43 : vector<1x1x8x128xf32> to vector<8x128xf32>
    %45 = vector.shape_cast %42 : vector<8x128xf32> to vector<1x1x8x128xf32>
    tpu.vector_store %arg4[%c0_21, %c1_22, %c0_23, %c0_24], %45 {strides = array<i32>} : memref<1x4x8x128xf32, #tpu.memory_space<vmem>>, vector<1x1x8x128xf32>,
    %c0_25 = arith.constant 0 : index
    %c2 = arith.constant 2 : index
    %c0_26 = arith.constant 0 : index
    %c0_27 = arith.constant 0 : index
    %46 = vector.load %arg4[%c0_25, %c2, %c0_26, %c0_27] : memref<1x4x8x128xf32, #tpu.memory_space<vmem>>, vector<1x1x8x128xf32>
    %47 = vector.shape_cast %46 : vector<1x1x8x128xf32> to vector<8x128xf32>
    %48 = arith.addf %47, %30 : vector<8x128xf32>
    %c0_28 = arith.constant 0 : index
    %c2_29 = arith.constant 2 : index
    %c0_30 = arith.constant 0 : index
    %c0_31 = arith.constant 0 : index
    %49 = vector.load %arg4[%c0_28, %c2_29, %c0_30, %c0_31] : memref<1x4x8x128xf32, #tpu.memory_space<vmem>>, vector<1x1x8x128xf32>
    %50 = vector.shape_cast %49 : vector<1x1x8x128xf32> to vector<8x128xf32>
    %51 = vector.shape_cast %48 : vector<8x128xf32> to vector<1x1x8x128xf32>
    tpu.vector_store %arg4[%c0_28, %c2_29, %c0_30, %c0_31], %51 {strides = array<i32>} : memref<1x4x8x128xf32, #tpu.memory_space<vmem>>, vector<1x1x8x128xf32>,
    %c0_32 = arith.constant 0 : index
    %c3 = arith.constant 3 : index
    %c0_33 = arith.constant 0 : index
    %c0_34 = arith.constant 0 : index
    %52 = vector.load %arg4[%c0_32, %c3, %c0_33, %c0_34] : memref<1x4x8x128xf32, #tpu.memory_space<vmem>>, vector<1x1x8x128xf32>
    %53 = vector.shape_cast %52 : vector<1x1x8x128xf32> to vector<8x128xf32>
    %54 = arith.addf %53, %33 : vector<8x128xf32>
    %c0_35 = arith.constant 0 : index
    %c3_36 = arith.constant 3 : index
    %c0_37 = arith.constant 0 : index
    %c0_38 = arith.constant 0 : index
    %55 = vector.load %arg4[%c0_35, %c3_36, %c0_37, %c0_38] : memref<1x4x8x128xf32, #tpu.memory_space<vmem>>, vector<1x1x8x128xf32>
    %56 = vector.shape_cast %55 : vector<1x1x8x128xf32> to vector<8x128xf32>
    %57 = vector.shape_cast %54 : vector<8x128xf32> to vector<1x1x8x128xf32>
    tpu.vector_store %arg4[%c0_35, %c3_36, %c0_37, %c0_38], %57 {strides = array<i32>} : memref<1x4x8x128xf32, #tpu.memory_space<vmem>>, vector<1x1x8x128xf32>,
    return
  }
  func.func @transform_0(%arg0: i32, %arg1: i32) -> (i32, i32) {
    %c1_i32 = arith.constant 1 : i32
    %0 = arith.muli %arg0, %c1_i32 : i32
    %1 = arith.addi %0, %arg1 : i32
    %c0_i32 = arith.constant 0 : i32
    %2 = arith.minsi %1, %c0_i32 : i32
    %c0_i32_0 = arith.constant 0 : i32
    %c0_i32_1 = arith.constant 0 : i32
    return %2, %c0_i32_0 : i32, i32
  }
  func.func @transform_1(%arg0: i32, %arg1: i32) -> (i32, i32) {
    %c1_i32 = arith.constant 1 : i32
    %0 = arith.muli %arg0, %c1_i32 : i32
    %1 = arith.addi %0, %arg1 : i32
    %c0_i32 = arith.constant 0 : i32
    %2 = arith.minsi %1, %c0_i32 : i32
    %c0_i32_0 = arith.constant 0 : i32
    %c0_i32_1 = arith.constant 0 : i32
    return %2, %c0_i32_0 : i32, i32
  }
  func.func @transform_2(%arg0: i32, %arg1: i32) -> (i32, i32, i32, i32) {
    %c0_i32 = arith.constant 0 : i32
    %c0_i32_0 = arith.constant 0 : i32
    %c0_i32_1 = arith.constant 0 : i32
    %c0_i32_2 = arith.constant 0 : i32
    return %arg0, %c0_i32, %c0_i32_0, %c0_i32_1 : i32, i32, i32, i32
  }
}

</mosaic_0001>

<bundles_post_ra>
// kernel: tpu_custom_call.1
= control target key start
LH: loop header
LB: loop body
LE: loop exit
PB: predicated region body
PF: predicated region fallthrough
CT: control target
= control target key end

     0   :  { %7 = vsyncpa [#allocation3], 0  ;;  %s290_s0 = inlined_call_operand.hbm [shape: f32[16,128], index: 0, kind: input, shape index: {}]   ;;  %s291_s1 = inlined_call_operand.hbm [shape: f32[16,128], index: 1, kind: input, shape index: {}]   ;;  %s292_s2 = inlined_call_operand.hbm [shape: f32[1,4,8,128], index: 2, kind: output, shape index: {}]  }
   0x1   :  { %8 = vsyncpa [#allocation6], 0 }
   0x2   :  { %9 = vsyncpa [#allocation4], 0  ;;  %s225_s9 = smov [#allocation2]   ;;  %s153_s13 = scalar_lea.hbm %s290_s0, 256 }
   0x3   :  { %s21_s10 = sshll.u32 %s225_s9, 4  ;;  %p154_p0 = scmp.ne.s32.totalorder %s290_s0, %s153_s13  ;;  %s22_s10 = int_to_ptr.vmem [resolvable:$true] %s21_s10 }
   0x4   :  { %p157_p1 = scmp.lt.u32.totalorder %s153_s13, %s290_s0 }
   0x6   :  { %p159_p2 = pnand %p157_p1, %p154_p0 }
   0x8   :  { %162 = shalt.err (!%p159_p2)
}
   0x9   :  { %s163_s18 = scalar_lea.vmem %s22_s10, 256  ;;  %p168_p4 = scmp.lt.s32.totalorder %s22_s10, %s22_s10 }
   0xa   :  { %p164_p3 = scmp.ne.s32.totalorder %s22_s10, %s163_s18  ;;  %p169_p5 = scmp.lt.s32.totalorder %s163_s18, %s163_s18 }
   0xc   :  { %p170_p6 = por %p169_p5, %p168_p4 }
   0xe   :  { %p171_p7 = pnand %p170_p6, %p164_p3 }
  0x10   :  { %174 = shalt.err (!%p171_p7)
}
  0x11   :  { %s226_s19 = smov 128   ;;  %s227_s20 = smov 8  }
  0x12   :  { %27 = dma.hbm_to_vmem [thread:$0]  %s290_s0, 256, %s22_s10, [#allocation3], %s226_s19, %s226_s19, %s227_s20  }
  0x13   :  { %s228_s23 = smov [#allocation5]   ;;  %s175_s27 = scalar_lea.hbm %s291_s1, 256 }
  0x14   :  { %s39_s24 = sshll.u32 %s228_s23, 4  ;;  %p176_p8 = scmp.ne.s32.totalorder %s291_s1, %s175_s27  ;;  %s40_s24 = int_to_ptr.vmem [resolvable:$true] %s39_s24 }
  0x15   :  { %p179_p9 = scmp.lt.u32.totalorder %s175_s27, %s291_s1 }
  0x17   :  { %p181_p10 = pnand %p179_p9, %p176_p8 }
  0x19   :  { %184 = shalt.err (!%p181_p10)
}
  0x1a   :  { %s185_s4 = scalar_lea.vmem %s40_s24, 256  ;;  %p190_p12 = scmp.lt.s32.totalorder %s40_s24, %s40_s24 }
  0x1b   :  { %p186_p11 = scmp.ne.s32.totalorder %s40_s24, %s185_s4  ;;  %p191_p13 = scmp.lt.s32.totalorder %s185_s4, %s185_s4 }
  0x1d   :  { %p192_p0 = por %p191_p13, %p190_p12 }
  0x1f   :  { %p193_p1 = pnand %p192_p0, %p186_p11 }
  0x21   :  { %196 = shalt.err (!%p193_p1)
}
  0x22   :  { %45 = dma.hbm_to_vmem [thread:$0]  %s291_s1, 256, %s40_s24, [#allocation6], %s226_s19, %s226_s19, %s227_s20  }
  0x23   :  { %219 = dma.done.wait [#allocation3], 256  }
  0x24   :  { %220 = vsyncadd [#allocation3], 4294967040 }
  0x25   :  { %221 = dma.done.wait [#allocation6], 256  }
  0x26   :  { %222 = vsyncadd [#allocation6], 4294967040  ;;  %v68_v0 = vld [vmem:[#allocation2] sm:$0xff]  ;;  %v69_v1 = vld [vmem:[#allocation2 + $0x8] sm:$0xff]  ;;  %s229_s1 = smov [#allocation7]  }
  0x27   :  { %v70_v2 = vld [vmem:[#allocation5] sm:$0xff]  ;;  %v71_v3 = vld [vmem:[#allocation5 + $0x8] sm:$0xff]  ;;  %145 = vlog2.f32 %v68_v0  ;;  %v78_v4 = vsub.f32 1.0, %v68_v0  ;;  %v79_v5 = vsub.f32 1.0, %v69_v1  ;;  %v98_v8 = vadd.f32 %v69_v1, %v68_v0  ;;  %s122_s6 = sshll.u32 %s229_s1, 4  ;;  %s123_s6 = int_to_ptr.vmem [resolvable:$true] %s122_s6 }
  0x28   :  { %v94_v6 = vmul.f32 %v70_v2, %v68_v0  ;;  %147 = vlog2.f32 %v69_v1  ;;  %v95_v7 = vmul.f32 %v71_v3, %v69_v1  ;;  %v100_v9 = vadd.f32 %v71_v3, %v70_v2  ;;  %s197_s7 = scalar_lea.vmem %s123_s6, 512  ;;  %p202_p3 = scmp.lt.s32.totalorder %s123_s6, %s123_s6 }
  0x29   :  { %149 = vlog2.f32 %v78_v4  ;;  %112 = vst [vmem:[#allocation7 + $0x10] sm:$0xff] %v98_v8  ;;  %p198_p2 = scmp.ne.s32.totalorder %s123_s6, %s197_s7  ;;  %p203_p4 = scmp.lt.s32.totalorder %s197_s7, %s197_s7 }
  0x2a   :  { %151 = vlog2.f32 %v79_v5  ;;  %v96_v10 = vadd.f32 %v95_v7, %v94_v6  ;;  %116 = vst [vmem:[#allocation7 + $0x18] sm:$0xff] %v100_v9 }
  0x2b   :  { %p204_p5 = por %p203_p4, %p202_p3 }
  0x2c   :  { %108 = vst [vmem:[#allocation7 + $0x8] sm:$0xff] %v96_v10 }
  0x2d   :  { %p205_p6 = pnand %p204_p5, %p198_p2 }
  0x31   :  { %v146_v11 = vpop.eup %145 }
  0x32   :  { %v148_v12 = vpop.eup %147  ;;  %v73_v13 = vmul.f32 0.6931472, %v146_v11 }
  0x33   :  { %v150_v14 = vpop.eup %149  ;;  %v75_v15 = vmul.f32 0.6931472, %v148_v12 }
  0x34   :  { %v152_v16 = vpop.eup %151  ;;  %v76_v17 = vmax.f32 %v73_v13, -100.0  ;;  %v81_v18 = vmul.f32 0.6931472, %v150_v14 }
  0x35   :  { %v77_v19 = vmax.f32 %v75_v15, -100.0  ;;  %v83_v20 = vmul.f32 0.6931472, %v152_v16 }
  0x36   :  { %v84_v21 = vmax.f32 %v81_v18, -100.0 }
  0x37   :  { %v85_v22 = vmax.f32 %v83_v20, -100.0 }
  0x38   :  { %v86_v23 = vsub.f32 %v76_v17, %v84_v21 }
  0x39   :  { %v87_v24 = vsub.f32 %v77_v19, %v85_v22 }
  0x3a   :  { %v88_v25 = vmul.f32 %v86_v23, %v70_v2 }
  0x3b   :  { %v89_v26 = vmul.f32 %v87_v24, %v71_v3 }
  0x3c   :  { %v90_v27 = vadd.f32 %v88_v25, %v84_v21 }
  0x3d   :  { %v91_v28 = vadd.f32 %v89_v26, %v85_v22 }
  0x3f   :  { %v92_v29 = vadd.f32 %v91_v28, %v90_v27 }
  0x41   :  { %104 = vst [vmem:[#allocation7] sm:$0xff] %v92_v29 }
  0x42   :  { %208 = shalt.err (!%p205_p6)
}
  0x43   :  { %s209_s10 = scalar_lea.hbm %s292_s2, 512 }
  0x44   :  { %p210_p7 = scmp.ne.s32.totalorder %s292_s2, %s209_s10  ;;  %p213_p8 = scmp.lt.u32.totalorder %s209_s10, %s292_s2 }
  0x46   :  { %p215_p9 = pnand %p213_p8, %p210_p7 }
  0x48   :  { %218 = shalt.err (!%p215_p9)
}
  0x49   :  { %128 = dma.vmem_to_hbm [thread:$0]  %s123_s6, 512, %s292_s2, [#allocation4], %s226_s19, %s226_s19, %s227_s20  }
  0x4a   :  { %223 = dma.done.wait [#allocation4], 512  }
  0x4b   :  { %224 = vsyncadd [#allocation4], 4294966784 }
  0x4c   :  { %132 = vsyncpa [#allocation3], 1 }
  0x4d   :  { %133 = vsyncpa [#allocation6], 1 }
  0x4e   :  { %134 = vsyncpa [#allocation4], 1 }

</bundles_post_ra>
